<compile_context>
chip_gen: v5e
topology: v5e:2x2
jax: 0.10.0
libtpu: 0.0.40
codegen_flags: <defaults>
</compile_context>

<pallas_src>
import numpy as np
import jax
import jax.numpy as jnp
from jax.experimental import pallas as pl
from jax.experimental.pallas import tpu as pltpu

LANE = 128
VMEM_LIMIT_BYTES = 48 * 1024 * 1024  # > default scoped limit, < v7x 64 MiB physical


def _round_up(x, m):
    return (x + m - 1) // m * m


def _project(h, snorm, w_cat_bf16, d_out_p, use_linear, tile_m):
    """Row-tiled fused projection.

    y    = h_bf16 @ [W_conv | W_lin]   (single MXU push, f32 accumulation)
    proj = snorm * y[:, :d_out_p]      (src-degree norm post-accumulate, f32) -> bf16
    lin  = y[:, d_out_p:]              (skip path, only if use_linear)        -> bf16
    """
    n, d_in = h.shape
    w_cols = w_cat_bf16.shape[1]
    grid = (n // tile_m,)

    def kernel(h_ref, sn_ref, w_ref, *out_refs):
        h_bf = h_ref[...].astype(jnp.bfloat16)
        y = jnp.dot(h_bf, w_ref[...], preferred_element_type=jnp.float32)
        proj = y[:, :d_out_p] * sn_ref[...]
        out_refs[0][...] = proj.astype(jnp.bfloat16)
        if use_linear:
            out_refs[1][...] = y[:, d_out_p:].astype(jnp.bfloat16)

    in_specs = [
        pl.BlockSpec((tile_m, d_in), lambda i: (i, 0)),
        pl.BlockSpec((tile_m, 1), lambda i: (i, 0)),
        pl.BlockSpec((d_in, w_cols), lambda i: (0, 0)),   # bf16 weights, constant index
    ]
    if use_linear:
        out_shape = (jax.ShapeDtypeStruct((n, d_out_p), jnp.bfloat16),
                     jax.ShapeDtypeStruct((n, d_out_p), jnp.bfloat16))
        out_specs = (pl.BlockSpec((tile_m, d_out_p), lambda i: (i, 0)),
                     pl.BlockSpec((tile_m, d_out_p), lambda i: (i, 0)))
    else:
        out_shape = jax.ShapeDtypeStruct((n, d_out_p), jnp.bfloat16)
        out_specs = pl.BlockSpec((tile_m, d_out_p), lambda i: (i, 0))

    out = pl.pallas_call(
        kernel,
        out_shape=out_shape,
        grid=grid,
        in_specs=in_specs,
        out_specs=out_specs,
        compiler_params=pltpu.CompilerParams(
            dimension_semantics=("parallel",),
            vmem_limit_bytes=VMEM_LIMIT_BYTES),
    )(h, snorm, w_cat_bf16)
    if use_linear:
        return out
    return out, None


def _aggregate(adj_i8, proj_bf16, dnorm, lin, scale, shift,
               apply_bn, apply_act, out_dtype, tile_d, tile_s):
    """K-tiled aggregation: out[i] = epilogue( sum_k A[i,k] @ proj[k] ).

    Grid = (dst tiles [parallel], src/contraction tiles [arbitrary, last]).
    Accumulates into a VMEM f32 scratch; epilogue fuses dnorm, skip add, folded
    bias/BN and ReLU; stores lane-dense (d_out_p multiple of 128).
    """
    n = adj_i8.shape[0]
    d_out_p = proj_bf16.shape[1]
    use_linear = lin is not None
    grid = (n // tile_d, n // tile_s)

    def kernel(*refs):
        refs = list(refs)
        acc_ref = refs.pop()                    # VMEM scratch (last)
        out_ref = refs.pop()                    # output
        adj_ref = refs.pop(0)
        proj_ref = refs.pop(0)
        dn_ref = refs.pop(0)
        lin_ref = refs.pop(0) if use_linear else None
        sc_ref = refs.pop(0) if apply_bn else None
        sh_ref = refs.pop(0)

        k = pl.program_id(1)

        @pl.when(k == 0)
        def _():
            acc_ref[...] = jnp.zeros_like(acc_ref)

        # int8 (0/1) adjacency slab -> bf16 MXU operand; upcast hides under MXU/DMA.
        adj_bf = adj_ref[...].astype(jnp.bfloat16)
        acc_ref[...] += jnp.dot(adj_bf, proj_ref[...],
                                preferred_element_type=jnp.float32)

        @pl.when(k == pl.num_programs(1) - 1)
        def _():
            out = acc_ref[...] * dn_ref[...]            # dst-side degree norm (deferred)
            if lin_ref is not None:
                out = out + lin_ref[...].astype(jnp.float32)
            if apply_bn:
                out = out * sc_ref[...]                 # folded eval-mode BN scale
            out = out + sh_ref[...]                     # folded bias + BN shift
            if apply_act:
                out = jnp.maximum(out, 0.0)
            out_ref[...] = out.astype(out_ref.dtype)

    in_specs = [
        pl.BlockSpec((tile_d, tile_s), lambda i, k: (i, k)),   # int8 adjacency slab
        pl.BlockSpec((tile_s, d_out_p), lambda i, k: (k, 0)),  # projected src features
        pl.BlockSpec((tile_d, 1), lambda i, k: (i, 0)),        # dst degree norm
    ]
    args = [adj_i8, proj_bf16, dnorm]
    if use_linear:
        in_specs.append(pl.BlockSpec((tile_d, d_out_p), lambda i, k: (i, 0)))
        args.append(lin)
    if apply_bn:
        in_specs.append(pl.BlockSpec((1, d_out_p), lambda i, k: (0, 0)))
        args.append(scale)
    in_specs.append(pl.BlockSpec((1, d_out_p), lambda i, k: (0, 0)))
    args.append(shift)

    return pl.pallas_call(
        kernel,
        out_shape=jax.ShapeDtypeStruct((n, d_out_p), out_dtype),
        grid=grid,
        in_specs=in_specs,
        out_specs=pl.BlockSpec((tile_d, d_out_p), lambda i, k: (i, 0)),
        scratch_shapes=[pltpu.VMEM((tile_d, d_out_p), jnp.float32)],
        compiler_params=pltpu.CompilerParams(
            dimension_semantics=("parallel", "arbitrary"),
            vmem_limit_bytes=VMEM_LIMIT_BYTES),
    )(*args)


def gcn_forward(adj, feat, layers, use_linear, n_classes,
                tile_m=256, tile_d=256, tile_s=512):
    """adj: (N, N) f32 dense, binary, dst x src; feat: (N, in_feats) f32.

    layers[i] = dict(w=(Din,Dout), w_lin=(Din,Dout), bias=(1,Dout)|None,
                     bn_scale=(1,Dout)|None, bn_shift=(1,Dout)|None)
    Returns (N, n_classes) f32.
    """
    n = adj.shape[0]
    tile_m, tile_d, tile_s = min(tile_m, n), min(tile_d, n), min(tile_s, n)
    assert n % tile_m == 0 and n % tile_d == 0 and n % tile_s == 0, \
        "demo requires N divisible by the tiles"  # TODO(synk): pad ragged N

    # norm='both': out-degree norm on sources, in-degree norm on destinations,
    # clamp(min=1) exactly as DGL's GraphConv does (guards zero-degree nodes).
    deg_out = jnp.maximum(jnp.sum(adj, axis=0), 1.0)
    deg_in = jnp.maximum(jnp.sum(adj, axis=1), 1.0)
    snorm = (deg_out ** -0.5).reshape(n, 1).astype(jnp.float32)
    dnorm = (deg_in ** -0.5).reshape(n, 1).astype(jnp.float32)
    # TODO(synk): int8 adjacency assumes binary (0/1) edges; weighted graphs need bf16 here.
    adj_i8 = adj.astype(jnp.int8)

    # TODO(synk): dropout0 / dropout and training-mode BatchNorm (batch statistics)
    # are not implemented; this is the eval-mode forward (dropouts identity, BN folded).
    h = feat
    n_layers = len(layers)
    for i, p in enumerate(layers):
        last = i == n_layers - 1
        d_in, d_out = p["w"].shape
        d_in_p = h.shape[1]                      # current (possibly padded) feature width
        d_out_p = _round_up(d_out, LANE)         # lane-dense outputs (e.g. 16 -> 128)

        def pad_w(x):                            # zero-pad rows to d_in_p, cols to d_out_p
            return jnp.pad(x.astype(jnp.float32),
                           ((0, d_in_p - d_in), (0, d_out_p - d_out)))

        def pad_vec(x):                          # zero-pad (1, d_out) -> (1, d_out_p)
            return jnp.pad(x.astype(jnp.float32), ((0, 0), (0, d_out_p - d_out)))

        # Fused [W_conv | W_lin] weight, cast to bf16 ONCE on the host.
        if use_linear:
            w_cat = jnp.concatenate([pad_w(p["w"]), pad_w(p["w_lin"])], axis=1)
        else:
            w_cat = pad_w(p["w"])
        w_cat = w_cat.astype(jnp.bfloat16)

        # Fold GraphConv bias + eval-mode BN into one per-channel scale/shift.
        bias = pad_vec(p["bias"]) if p["bias"] is not None else jnp.zeros((1, d_out_p), jnp.float32)
        if last:
            apply_bn, scale, shift = False, None, bias
        else:
            apply_bn = True
            scale = pad_vec(p["bn_scale"])
            shift = pad_vec(p["bn_shift"]) + bias * scale

        proj, lin = _project(h, snorm, w_cat, d_out_p, use_linear, tile_m)
        out_dtype = jnp.float32 if last else jnp.bfloat16
        h = _aggregate(adj_i8, proj, dnorm, lin, scale, shift,
                       apply_bn=apply_bn, apply_act=not last,
                       out_dtype=out_dtype, tile_d=tile_d, tile_s=tile_s)
    return h[:, :n_classes]


def reference_gcn(adj, feat, layers, use_linear):
    """Pure numpy (f64) reference mirroring the PyTorch/DGL eval-mode forward."""
    adj = np.asarray(adj, np.float64)
    h = np.asarray(feat, np.float64)
    snorm = np.maximum(adj.sum(0), 1.0) ** -0.5
    dnorm = np.maximum(adj.sum(1), 1.0) ** -0.5
    n_layers = len(layers)
    for i, p in enumerate(layers):
        w = np.asarray(p["w"], np.float64)
        conv = (adj @ ((h * snorm[:, None]) @ w)) * dnorm[:, None]
        if p["bias"] is not None:
            conv = conv + np.asarray(p["bias"], np.float64)
        if use_linear:
            h_new = conv + h @ np.asarray(p["w_lin"], np.float64)
        else:
            h_new = conv
        if i < n_layers - 1:
            h_new = (h_new * np.asarray(p["bn_scale"], np.float64)
                     + np.asarray(p["bn_shift"], np.float64))
            h_new = np.maximum(h_new, 0.0)
        h = h_new
    return h


if __name__ == "__main__":
    # Small shapes consistent with the module (2-layer GCN).
    N, IN_FEATS, N_HIDDEN, N_CLASSES, N_LAYERS = 256, 64, 128, 16, 2
    USE_LINEAR = True

    key = jax.random.PRNGKey(0)
    keys = jax.random.split(key, 16)

    # Random directed binary graph + self-loops (dst x src adjacency).
    adj = (jax.random.uniform(keys[0], (N, N)) < 0.05).astype(jnp.float32)
    adj = jnp.maximum(adj, jnp.eye(N, dtype=jnp.float32))

    feat = jax.random.normal(keys[1], (N, IN_FEATS), jnp.float32)

    layers = []
    kidx = 2
    for i in range(N_LAYERS):
        d_in = IN_FEATS if i == 0 else N_HIDDEN
        d_out = N_HIDDEN if i < N_LAYERS - 1 else N_CLASSES
        std = float(np.sqrt(2.0 / (d_in + d_out)))            # xavier-style init
        w = std * jax.random.normal(keys[kidx], (d_in, d_out), jnp.float32); kidx += 1
        w_lin = std * jax.random.normal(keys[kidx], (d_in, d_out), jnp.float32); kidx += 1
        has_bias = i == N_LAYERS - 1                          # bias only on last layer
        bias = (0.1 * jax.random.normal(keys[kidx], (1, d_out), jnp.float32)
                if has_bias else None); kidx += 1
        if i < N_LAYERS - 1:
            gamma = 1.0 + 0.1 * jax.random.normal(keys[kidx], (1, d_out), jnp.float32); kidx += 1
            beta = 0.1 * jax.random.normal(keys[kidx], (1, d_out), jnp.float32); kidx += 1
            r_mean = 0.1 * jax.random.normal(keys[kidx], (1, d_out), jnp.float32); kidx += 1
            r_var = 1.0 + 0.1 * jax.random.uniform(keys[kidx], (1, d_out), jnp.float32); kidx += 1
            bn_scale = gamma / jnp.sqrt(r_var + 1e-5)         # folded eval-mode BN
            bn_shift = beta - r_mean * bn_scale
        else:
            bn_scale = bn_shift = None
        layers.append(dict(w=w, w_lin=w_lin, bias=bias,
                           bn_scale=bn_scale, bn_shift=bn_shift))

    # Small tiles for the demo so both grid axes (dst-parallel, K-accumulate) run >1 step.
    out = gcn_forward(adj, feat, layers, use_linear=USE_LINEAR, n_classes=N_CLASSES,
                      tile_m=128, tile_d=128, tile_s=128)
    out = jax.block_until_ready(out)

    ref = reference_gcn(adj, feat, layers, USE_LINEAR)
    # bf16 MXU operands / bf16 hidden activations (f32 accumulation) vs f64 reference.
    np.testing.assert_allclose(np.asarray(out, np.float64), ref, rtol=5e-2, atol=5e-2)
    print("KERNEL_OK")
</pallas_src>

<mosaic_0001>
module attributes {stable_mosaic.version = 11 : i64} {
  func.func @kernel(%arg0: i32, %arg1: memref<128x64xf32, #tpu.memory_space<vmem>>, %arg2: memref<128x1xf32, #tpu.memory_space<vmem>>, %arg3: memref<64x256xbf16, #tpu.memory_space<vmem>>, %arg4: memref<128x128xbf16, #tpu.memory_space<vmem>>, %arg5: memref<128x128xbf16, #tpu.memory_space<vmem>>) attributes {dimension_semantics = [#tpu.dimension_semantics<parallel>], iteration_bounds = array<i64: 2>, scalar_prefetch = 0 : i64, scratch_operands = 0 : i64, tpu.core_type = #tpu.core_type<tc>, window_params = [{transform_indices = @transform_0, window_bounds = array<i64: 128, 64>}, {transform_indices = @transform_1, window_bounds = array<i64: 128, 1>}, {pipeline_mode = #tpu.pipeline_mode<synchronous>, transform_indices = @transform_2, window_bounds = array<i64: 64, 256>}, {transform_indices = @transform_3, window_bounds = array<i64: 128, 128>}, {transform_indices = @transform_4, window_bounds = array<i64: 128, 128>}]} {
    %c0 = arith.constant 0 : index
    %c0_0 = arith.constant 0 : index
    %0 = vector.load %arg1[%c0, %c0_0] : memref<128x64xf32, #tpu.memory_space<vmem>>, vector<128x64xf32>
    %1 = arith.truncf %0 : vector<128x64xf32> to vector<128x64xbf16>
    %c0_1 = arith.constant 0 : index
    %c0_2 = arith.constant 0 : index
    %2 = vector.load %arg3[%c0_1, %c0_2] : memref<64x256xbf16, #tpu.memory_space<vmem>>, vector<64x256xbf16>
    %cst = arith.constant dense<0.000000e+00> : vector<128x256xf32>
    %3 = tpu.matmul %1, %2, %cst {dimension_numbers = #tpu.dot_dimension_numbers<[1], [0], [0], [1], [0, 0, 1, 1], [], []>} : vector<128x64xbf16>, vector<64x256xbf16>, vector<128x256xf32> -> vector<128x256xf32>
    %4 = vector.extract_strided_slice %3 {offsets = [0, 0], sizes = [128, 128], strides = [1, 1]} : vector<128x256xf32> to vector<128x128xf32>
    %c0_3 = arith.constant 0 : index
    %c0_4 = arith.constant 0 : index
    %5 = vector.load %arg2[%c0_3, %c0_4] : memref<128x1xf32, #tpu.memory_space<vmem>>, vector<128x1xf32>
    %6 = vector.broadcast %5 : vector<128x1xf32> to vector<128x128xf32>
    %7 = arith.mulf %4, %6 : vector<128x128xf32>
    %8 = arith.truncf %7 : vector<128x128xf32> to vector<128x128xbf16>
    %c0_5 = arith.constant 0 : index
    %c0_6 = arith.constant 0 : index
    %9 = vector.load %arg4[%c0_5, %c0_6] : memref<128x128xbf16, #tpu.memory_space<vmem>>, vector<128x128xbf16>
    tpu.vector_store %arg4[%c0_5, %c0_6], %8 {strides = array<i32>} : memref<128x128xbf16, #tpu.memory_space<vmem>>, vector<128x128xbf16>,
    %10 = vector.extract_strided_slice %3 {offsets = [0, 128], sizes = [128, 128], strides = [1, 1]} : vector<128x256xf32> to vector<128x128xf32>
    %11 = arith.truncf %10 : vector<128x128xf32> to vector<128x128xbf16>
    %c0_7 = arith.constant 0 : index
    %c0_8 = arith.constant 0 : index
    %12 = vector.load %arg5[%c0_7, %c0_8] : memref<128x128xbf16, #tpu.memory_space<vmem>>, vector<128x128xbf16>
    tpu.vector_store %arg5[%c0_7, %c0_8], %11 {strides = array<i32>} : memref<128x128xbf16, #tpu.memory_space<vmem>>, vector<128x128xbf16>,
    return
  }
  func.func @transform_0(%arg0: i32) -> (i32, i32) {
    %c0_i32 = arith.constant 0 : i32
    %c0_i32_0 = arith.constant 0 : i32
    return %arg0, %c0_i32 : i32, i32
  }
  func.func @transform_1(%arg0: i32) -> (i32, i32) {
    %c0_i32 = arith.constant 0 : i32
    %c0_i32_0 = arith.constant 0 : i32
    return %arg0, %c0_i32 : i32, i32
  }
  func.func @transform_2(%arg0: i32) -> (i32, i32) {
    %c0_i32 = arith.constant 0 : i32
    %c0_i32_0 = arith.constant 0 : i32
    %c0_i32_1 = arith.constant 0 : i32
    return %c0_i32, %c0_i32_0 : i32, i32
  }
  func.func @transform_3(%arg0: i32) -> (i32, i32) {
    %c0_i32 = arith.constant 0 : i32
    %c0_i32_0 = arith.constant 0 : i32
    return %arg0, %c0_i32 : i32, i32
  }
  func.func @transform_4(%arg0: i32) -> (i32, i32) {
    %c0_i32 = arith.constant 0 : i32
    %c0_i32_0 = arith.constant 0 : i32
    return %arg0, %c0_i32 : i32, i32
  }
}

</mosaic_0001>

<bundles_post_ra>
// kernel: tpu_custom_call.1
= control target key start
LH: loop header
LB: loop body
LE: loop exit
PB: predicated region body
PF: predicated region fallthrough
CT: control target
= control target key end

     0   :  { %10 = vsyncpa [#allocation3], 0  ;;  %s1339_s0 = inlined_call_operand.vmem [shape: f32[256,64], index: 0, kind: input, shape index: {}]   ;;  %s1340_s1 = inlined_call_operand.vmem [shape: f32[256,1], index: 1, kind: input, shape index: {}]   ;;  %s1341_s2 = inlined_call_operand.vmem [shape: bf16[64,256], index: 2, kind: input, shape index: {}]   ;;  %s1342_s3 = inlined_call_operand.hbm [shape: bf16[256,128], index: 3, kind: output, shape index: {0}]   ;;  %s1343_s4 = inlined_call_operand.hbm [shape: bf16[256,128], index: 4, kind: output, shape index: {1}]  }
   0x1   :  { %12 = vsyncpa [#allocation3 + $0x1], 0 }
   0x2   :  { %13 = vsyncpa [#allocation5], 0 }
   0x3   :  { %15 = vsyncpa [#allocation5 + $0x1], 0  ;;  %s1102_s15 = smov 0   ;;  %s1104_s16 = smov 0  }
   0x4   :  { %s1106_s17 = smov 0   ;;  %s1108_s18 = smov 0  }
   0x5 LB: > { %s1123_s19 = sadd.s32 4294967295, %s1072_s18   ;;  %s750_s20 = sadd.s32 4294967294, %s1072_s18   ;;  %s1072_s18 = sphi %s1108_s18, %s1349_s18   ;;  %s1068_s17 = sphi %s1106_s17, %s1348_s17   ;;  %s1064_s16 = sphi %s1104_s16, %s1347_s16   ;;  %s1060_s15 = sphi %s1102_s15, %s1346_s15  }
   0x6   : > { %s1127_s21 = sadd.s32 1, %s1072_s18   ;;  %s101_s22 = sadd.s32 1, %s1068_s17 }
   0x7   : > { %s98_s23 = ssub.s32 %s1072_s18, %s1127_s21  ;;  %p111_p0 = scmp.ne.s32.totalorder %s1068_s17, %s1064_s16 }
   0x8   : > { %p99_p1 = scmp.eq.s32.totalorder %s98_s23, 0  ;;  %p112_p2 = scmp.eq.s32.totalorder %s1123_s19, 1 }
   0x9   : > { %p117_p3 = scmp.ne.s32.totalorder %s1064_s16, %s1060_s15  ;;  %p118_p4 = scmp.eq.s32.totalorder %s750_s20, 1 }
   0xa   : > { %s1138_s24 = scalar_select %p99_p1, %s1068_s17, %s101_s22  }
   0xb   : > { %p1140_p5 = por %p112_p2, %p111_p0  ;;  %p1144_p6 = por %p118_p4, %p117_p3 }
   0xc   : > { %p753_p7 = scmp.ge.s32.totalorder %s1072_s18, 1  ;;  %p183_p8 = scmp.lt.s32.totalorder %s1072_s18, 3 }
   0xe   : > { %p184_p9 = pnand %p753_p7, %p183_p8 }
   0xf   : > { %s756_s23 = sshll.u32 (!%p184_p9), %s1123_s19, 4  ;;  %s1258_s7 = sand.u32 (!%p184_p9), 1, %s1064_s16  }
  0x10   : > { %187 = sbr.rel (%p184_p9) target bundleno = 247 (0xf7), region = 32  ;;  %p220_p10 = scmp.lt.s32.totalorder (!%p184_p9), %s756_s23, 31 }
  0x11   : > { %s754_s8 = sshll.u32 (!%p184_p9), %s1258_s7, 6  ;;  %s824_s11 = sshll.u32 (!%p184_p9), %s1123_s19, 6 }
  0x12   : > { %s1266_s10 = scalar_lea.vmem (!%p184_p9), [#allocation2], %s754_s8  ;;  %s622_s14 = scalar_lea.hbm (!%p184_p9), %s1342_s3, %s824_s11 }
  0x13   : > { %s639_s27 = scalar_lea.hbm (!%p184_p9), %s1343_s4, %s824_s11  ;;  %s623_s19 = sshll.u32 (!%p184_p9), %s1266_s10, 4  ;;  %s624_s19 = int_to_ptr.vmem [resolvable:$true] %s623_s19 }
  0x14   : > { %s625_s28 = sshll.u32 (!%p184_p9), %s622_s14, 4  ;;  %s606_s30 = scalar_lea.sflag (!%p184_p9), [#allocation3], %s1258_s7  ;;  %s626_s28 = int_to_ptr.hbm [resolvable:$true] %s625_s28 }
  0x15   : > { %v786_v0 = vld [vmem:[%s1341_s2 + $0x30] sm:$0xf]  ;;  %v823_v1 = vld [vmem:[%s1341_s2 + $0x34] sm:$0xf0]  ;;  %v822_v2 = vld [vmem:[%s1341_s2 + $0x34] sm:$0xf] }
  0x16   : > { %v787_v3 = vor.u32 %v823_v1, %v786_v0  ;;  %v788_v4 = vld [vmem:[%s1341_s2 + $0x38] sm:$0xf0]  ;;  %v778_v5 = vld [vmem:[%s1341_s2 + $0x20] sm:$0xf]  ;;  %v821_v6 = vld [vmem:[%s1341_s2 + $0x24] sm:$0xf0] }
  0x17   : > { %v791_v7 = vor.u32 %v822_v2, %v788_v4  ;;  %v820_v8 = vld [vmem:[%s1341_s2 + $0x24] sm:$0xf]  ;;  %v780_v9 = vld [vmem:[%s1341_s2 + $0x28] sm:$0xf0]  ;;  %v779_v10 = vor.u32 %v821_v6, %v778_v5  ;;  %v770_v12 = vld [vmem:[%s1341_s2 + $0x10] sm:$0xf] }
  0x18   : > { %335 = vmatpush.bf16.msra.mxu0 %v787_v3  ;;  %920 = vmatpush.bf16.msra.mxu2 %v787_v3  ;;  %v783_v11 = vor.u32 %v820_v8, %v780_v9  ;;  %v819_v13 = vld [vmem:[%s1341_s2 + $0x14] sm:$0xf0]  ;;  %v1074_v14 = vmov 0   ;;  %v818_v15 = vld [vmem:[%s1341_s2 + $0x14] sm:$0xf]  ;;  %s1351_s23 = smov (!%p220_p10, %s756_s23), 31 }
  0x19   : > { %384 = vmatpush.bf16.msra.mxu1 %v791_v7  ;;  %924 = vmatpush.bf16.msra.mxu3 %v791_v7  ;;  %v772_v16 = vld [vmem:[%s1341_s2 + $0x18] sm:$0xf0]  ;;  %v771_v17 = vor.u32 %v819_v13, %v770_v12  ;;  %s757_s9 = sshll.u32 %s1351_s23, 3  ;;  %v762_v19 = vld [vmem:[%s1341_s2] sm:$0xf]  ;;  %vm306_vm0 = vcmask 523264  }
  0x1a   : > { %975 = vset.pattern.permute.xlu0 %v1074_v14  ;;  %976 = vset.pattern.permute.xlu1 %v1074_v14  ;;  %v775_v18 = vor.u32 %v818_v15, %v772_v16  ;;  %v817_v20 = vld [vmem:[%s1341_s2 + $0x4] sm:$0xf0]  ;;  %s1196_s22 = scalar_lea.vmem %s1340_s1, %s757_s9  ;;  %s1201_s29 = scalar_lea.vmem %s1339_s0, %s757_s9  ;;  %v816_v21 = vld [vmem:[%s1341_s2 + $0x4] sm:$0xf]  ;;  %v764_v22 = vld [vmem:[%s1341_s2 + $0x8] sm:$0xf0] }
  0x1b   : > { %977 = vset.pattern.permute.xlu2 %v1074_v14  ;;  %v429_v23 = vld [vmem:[%s1196_s22] sm:$0xff]  ;;  %v763_v25 = vor.u32 %v817_v20, %v762_v19  ;;  %v235_v26 = vld [vmem:[%s1201_s29 + $0x8] sm:$0xff]  ;;  %v767_v29 = vor.u32 %v816_v21, %v764_v22  ;;  %v431_v30 = vld [vmem:[%s1196_s22 + $0x10] sm:$0xff]  ;;  %s1263_s9 = scalar_lea.vmem [#allocation4], %s754_s8  ;;  %s642_s23 = sshll.u32 %s639_s27, 4  ;;  %s1294_s23 = int_to_ptr.hbm [resolvable:$true] %s642_s23 }
  0x1c   : > { %336 = vmatpush.bf16.msra.mxu0 %v779_v10  ;;  %921 = vmatpush.bf16.msra.mxu2 %v779_v10  ;;  %v234_v24 = vld [vmem:[%s1201_s29] sm:$0xff]  ;;  %v243_v28 = vld [vmem:[%s1201_s29 + $0x48] sm:$0xff]  ;;  %v432_v35 = vld [vmem:[%s1196_s22 + $0x18] sm:$0xff]  ;;  %s992_s5 = sshra.s32 %s626_s28, 4  ;;  %s998_s12 = scalar_lea.hbm %s1342_s3, 128  ;;  %s993_s5 = int_to_ptr.hbm [resolvable:$true] %s992_s5 }
  0x1d   : > { %385 = vmatpush.bf16.msra.mxu1 %v783_v11  ;;  %925 = vmatpush.bf16.msra.mxu3 %v783_v11  ;;  %v242_v27 = vld [vmem:[%s1201_s29 + $0x40] sm:$0xff]  ;;  %v250_v31 = vpack.c.bf16 %v235_v26, %v234_v24  ;;  %v430_v34 = vld [vmem:[%s1196_s22 + $0x8] sm:$0xff]  ;;  %v435_v37 = vld [vmem:[%s1196_s22 + $0x30] sm:$0xff]  ;;  %s994_s6 = scalar_lea.hbm %s993_s5, 64  ;;  %p999_p0 = scmp.lt.s32.totalorder %s993_s5, %s1342_s3 }
  0x1e   : > { %447 = vperm.xlu0 %975, %v429_v23   ;;  %457 = vperm.xlu1 %976, %v431_v30   ;;  %v254_v32 = vpack.c.bf16 %v243_v28, %v242_v27  ;;  %v433_v33 = vld [vmem:[%s1196_s22 + $0x20] sm:$0xff]  ;;  %v434_v36 = vld [vmem:[%s1196_s22 + $0x28] sm:$0xff]  ;;  %v236_v38 = vld [vmem:[%s1201_s29 + $0x10] sm:$0xff]  ;;  %p995_p11 = scmp.ne.s32.totalorder %s993_s5, %s994_s6  ;;  %p1000_p1 = scmp.lt.s32.totalorder %s998_s12, %s994_s6 }
  0x1f   : > { %467 = vperm.xlu2 %977, %v433_v33   ;;  %v436_v39 = vld [vmem:[%s1196_s22 + $0x38] sm:$0xff]  ;;  %v244_v41 = vld [vmem:[%s1201_s29 + $0x50] sm:$0xff]  ;;  %v437_v45 = vld [vmem:[%s1196_s22 + $0x40] sm:$0xff] }
  0x20   : > { %337 = vmatpush.bf16.msra.mxu0 %v771_v17  ;;  %922 = vmatpush.bf16.msra.mxu2 %v771_v17  ;;  %v237_v40 = vld [vmem:[%s1201_s29 + $0x18] sm:$0xff]  ;;  %v438_v46 = vld [vmem:[%s1196_s22 + $0x48] sm:$0xff]  ;;  %v439_v47 = vld [vmem:[%s1196_s22 + $0x50] sm:$0xff]  ;;  %p996_p12 = pnand %p995_p11, %p1140_p5  ;;  %p1001_p2 = por %p1000_p1, %p999_p0 }
  0x21   : > { %386 = vmatpush.bf16.msra.mxu1 %v775_v18  ;;  %926 = vmatpush.bf16.msra.mxu3 %v775_v18  ;;  %v245_v42 = vld [vmem:[%s1201_s29 + $0x58] sm:$0xff]  ;;  %v251_v43 = vpack.c.bf16 %v237_v40, %v236_v38  ;;  %v441_v49 = vld [vmem:[%s1196_s22 + $0x60] sm:$0xff]  ;;  %v442_v51 = vld [vmem:[%s1196_s22 + $0x68] sm:$0xff] }
  0x22   : > { %v255_v44 = vpack.c.bf16 %v245_v42, %v244_v41  ;;  %v440_v48 = vld [vmem:[%s1196_s22 + $0x58] sm:$0xff]  ;;  %v238_v50 = vld [vmem:[%s1201_s29 + $0x20] sm:$0xff]  ;;  %v239_v52 = vld [vmem:[%s1201_s29 + $0x28] sm:$0xff]  ;;  %p997_p13 = pneg %p996_p12 }
  0x23   : > { %v246_v53 = vld [vmem:[%s1201_s29 + $0x60] sm:$0xff]  ;;  %v247_v54 = vld [vmem:[%s1201_s29 + $0x68] sm:$0xff]  ;;  %v252_v55 = vpack.c.bf16 %v239_v52, %v238_v50  ;;  %v443_v57 = vld [vmem:[%s1196_s22 + $0x70] sm:$0xff] }
  0x24   : > { %338 = vmatpush.bf16.msra.mxu0 %v763_v25  ;;  %923 = vmatpush.bf16.msra.mxu2 %v763_v25  ;;  %v256_v56 = vpack.c.bf16 %v247_v54, %v246_v53  ;;  %v444_v58 = vld [vmem:[%s1196_s22 + $0x78] sm:$0xff]  ;;  %v240_v59 = vld [vmem:[%s1201_s29 + $0x30] sm:$0xff]  ;;  %p1002_p3 = pnand %p1001_p2, %p997_p13 }
  0x25   : > { %387 = vmatpush.bf16.msra.mxu1 %v767_v29  ;;  %927 = vmatpush.bf16.msra.mxu3 %v767_v29  ;;  %v241_v60 = vld [vmem:[%s1201_s29 + $0x38] sm:$0xff]  ;;  %v248_v61 = vld [vmem:[%s1201_s29 + $0x70] sm:$0xff] }
  0x26   : > { %452 = vperm.xlu0 %975, %v430_v34   ;;  %462 = vperm.xlu1 %976, %v432_v35   ;;  %v249_v62 = vld [vmem:[%s1201_s29 + $0x78] sm:$0xff]  ;;  %v253_v63 = vpack.c.bf16 %v241_v60, %v240_v59  ;;  %s640_s29 = sshll.u32 %s1263_s9, 4  ;;  %s1292_s29 = int_to_ptr.vmem [resolvable:$true] %s640_s29 }
  0x27   : > { %792 = vmatmul.msk.bf16.vlgmr.msra.gmra.mxu0 %vm306_vm0, %v250_v31  ;;  %796 = vmatmul.msk.bf16.vlgmr.msra.gmra.mxu2 %vm306_vm0, %v254_v32  ;;  %v257_v0 = vpack.c.bf16 %v249_v62, %v248_v61 }
  0x28   : > { %800 = vmatmul.msk.bf16.vlgmr.msra.gmra.mxu1 %vm306_vm0, %v250_v31  ;;  %804 = vmatmul.msk.bf16.vlgmr.msra.gmra.mxu3 %vm306_vm0, %v254_v32 }
  0x29   : > { %472 = vperm.xlu2 %977, %v434_v36  }
  0x2e   : > { %477 = vperm.xlu0 %975, %v435_v37   ;;  %482 = vperm.xlu1 %976, %v436_v39  }
  0x31   : > { %487 = vperm.xlu2 %977, %v437_v45  }
  0x36   : > { %492 = vperm.xlu0 %975, %v438_v46   ;;  %497 = vperm.xlu1 %976, %v439_v47  }
  0x37   : > { %793 = vmatmul.msk.bf16.gmra.mxu0 %vm306_vm0, %v251_v43  ;;  %797 = vmatmul.msk.bf16.gmra.mxu2 %vm306_vm0, %v255_v44 }
  0x38   : > { %801 = vmatmul.msk.bf16.gmra.mxu1 %vm306_vm0, %v251_v43  ;;  %805 = vmatmul.msk.bf16.gmra.mxu3 %vm306_vm0, %v255_v44 }
  0x39   : > { %502 = vperm.xlu2 %977, %v440_v48  }
  0x3e   : > { %507 = vperm.xlu0 %975, %v441_v49   ;;  %512 = vperm.xlu1 %976, %v442_v51  }
  0x41   : > { %517 = vperm.xlu2 %977, %v443_v57  }
  0x46   : > { %522 = vperm.xlu0 %975, %v444_v58  }
  0x47   : > { %794 = vmatmul.msk.bf16.gmra.mxu0 %vm306_vm0, %v252_v55  ;;  %798 = vmatmul.msk.bf16.gmra.mxu2 %vm306_vm0, %v256_v56 }
  0x48   : > { %802 = vmatmul.msk.bf16.gmra.mxu1 %vm306_vm0, %v252_v55  ;;  %806 = vmatmul.msk.bf16.gmra.mxu3 %vm306_vm0, %v256_v56 }
  0x57   : > { %795 = vmatmul.msk.bf16.gmra.mxu0 %vm306_vm0, %v253_v63  ;;  %799 = vmatmul.msk.bf16.gmra.mxu2 %vm306_vm0, %v257_v0 }
  0x58   : > { %803 = vmatmul.msk.bf16.gmra.mxu1 %vm306_vm0, %v253_v63  ;;  %807 = vmatmul.msk.bf16.gmra.mxu3 %vm306_vm0, %v257_v0 }
  0x79   : > { %v468_v2 = vpop.permute.xlu2 %467 }
  0x83   : > { %v473_v7 = vpop.permute.xlu2 %472 }
  0x8b   : > { %v488_v18 = vpop.permute.xlu2 %487 }
  0x90   : > { %v448_v1 = vpop.permute.xlu0 %447  ;;  %v458_v4 = vpop.permute.xlu1 %457 }
  0x93   : > { %v503_v38 = vpop.permute.xlu2 %502 }
  0x98   : > { %v453_v3 = vpop.permute.xlu0 %452  ;;  %v463_v11 = vpop.permute.xlu1 %462 }
  0xa0   : > { %v1260_v8 = vpop.permute.xlu0 %477  ;;  %v483_v28 = vpop.permute.xlu1 %482 }
  0xa4   : > { %v340_v5 = vpop.f32.mrf.mxu0 }
  0xa5   : > { %v389_v6 = vpop.f32.mrf.mxu1  ;;  %v525_v13 = vmul.f32 %v448_v1, %v340_v5 }
  0xa8   : > { %v493_v19 = vpop.permute.xlu0 %492  ;;  %v498_v37 = vpop.permute.xlu1 %497 }
  0xaa   : > { %v360_v9 = vpop.f32.mrf.mxu2 }
  0xab   : > { %v409_v10 = vpop.f32.mrf.mxu3  ;;  %v533_v21 = vmul.f32 %v488_v18, %v360_v9 }
  0xac   : > { %v342_v12 = vpop.f32.mrf.mxu0 }
  0xad   : > { %v526_v14 = vmul.f32 %v453_v3, %v342_v12  ;;  %v391_v15 = vpop.f32.mrf.mxu1 }
  0xae   : > { %v869_v16 = vpack.c.bf16 %v391_v15, %v389_v6 }
  0xaf   : > { %v829_v17 = vpack.c.bf16 %v526_v14, %v525_v13 }
  0xb0   : > { %870 = vst [vmem:[%s1263_s9] sm:$0xff] %v869_v16   ;;  %v508_v55 = vpop.permute.xlu0 %507  ;;  %v513_v56 = vpop.permute.xlu1 %512 }
  0xb1   : > { %830 = vst [vmem:[%s1266_s10] sm:$0xff] %v829_v17  }
  0xb2   : > { %v362_v20 = vpop.f32.mrf.mxu2 }
  0xb3   : > { %v534_v22 = vmul.f32 %v493_v19, %v362_v20  ;;  %v411_v23 = vpop.f32.mrf.mxu3 }
  0xb4   : > { %v889_v24 = vpack.c.bf16 %v411_v23, %v409_v10  ;;  %v345_v25 = vpop.f32.mrf.mxu0  ;;  %v518_v10 = vpop.permute.xlu2 %517 }
  0xb5   : > { %v849_v26 = vpack.c.bf16 %v534_v22, %v533_v21  ;;  %v394_v27 = vpop.f32.mrf.mxu1  ;;  %v527_v32 = vmul.f32 %v458_v4, %v345_v25 }
  0xb6   : > { %916 = vst [vmem:[%s1263_s9 + $0x20] sm:$0xff] %v889_v24  }
  0xb7   : > { %909 = vst [vmem:[%s1266_s10 + $0x20] sm:$0xff] %v849_v26  }
  0xba   : > { %v365_v29 = vpop.f32.mrf.mxu2 }
  0xbb   : > { %v414_v30 = vpop.f32.mrf.mxu3  ;;  %v535_v40 = vmul.f32 %v498_v37, %v365_v29 }
  0xbc   : > { %v347_v31 = vpop.f32.mrf.mxu0 }
  0xbd   : > { %v528_v33 = vmul.f32 %v463_v11, %v347_v31  ;;  %v396_v34 = vpop.f32.mrf.mxu1 }
  0xbe   : > { %v874_v35 = vpack.c.bf16 %v396_v34, %v394_v27 }
  0xbf   : > { %v834_v36 = vpack.c.bf16 %v528_v33, %v527_v32 }
  0xc0   : > { %913 = vst [vmem:[%s1263_s9 + $0x8] sm:$0xff] %v874_v35  }
  0xc1   : > { %906 = vst [vmem:[%s1266_s10 + $0x8] sm:$0xff] %v834_v36  }
  0xc2   : > { %v367_v39 = vpop.f32.mrf.mxu2 }
  0xc3   : > { %v536_v41 = vmul.f32 %v503_v38, %v367_v39  ;;  %v416_v42 = vpop.f32.mrf.mxu3 }
  0xc4   : > { %v894_v43 = vpack.c.bf16 %v416_v42, %v414_v30  ;;  %v350_v44 = vpop.f32.mrf.mxu0 }
  0xc5   : > { %v854_v45 = vpack.c.bf16 %v536_v41, %v535_v40  ;;  %v399_v46 = vpop.f32.mrf.mxu1  ;;  %v529_v50 = vmul.f32 %v468_v2, %v350_v44 }
  0xc6   : > { %917 = vst [vmem:[%s1263_s9 + $0x28] sm:$0xff] %v894_v43  }
  0xc7   : > { %910 = vst [vmem:[%s1266_s10 + $0x28] sm:$0xff] %v854_v45  }
  0xca   : > { %v370_v47 = vpop.f32.mrf.mxu2 }
  0xcb   : > { %v419_v48 = vpop.f32.mrf.mxu3  ;;  %v537_v58 = vmul.f32 %v508_v55, %v370_v47 }
  0xcc   : > { %v352_v49 = vpop.f32.mrf.mxu0 }
  0xcd   : > { %v530_v51 = vmul.f32 %v473_v7, %v352_v49  ;;  %v401_v52 = vpop.f32.mrf.mxu1 }
  0xce   : > { %v879_v53 = vpack.c.bf16 %v401_v52, %v399_v46 }
  0xcf   : > { %v839_v54 = vpack.c.bf16 %v530_v51, %v529_v50 }
  0xd0   : > { %914 = vst [vmem:[%s1263_s9 + $0x10] sm:$0xff] %v879_v53  }
  0xd1   : > { %907 = vst [vmem:[%s1266_s10 + $0x10] sm:$0xff] %v839_v54  }
  0xd2   : > { %v372_v57 = vpop.f32.mrf.mxu2 }
  0xd3   : > { %v538_v59 = vmul.f32 %v513_v56, %v372_v57  ;;  %v421_v60 = vpop.f32.mrf.mxu3 }
  0xd4   : > { %v899_v61 = vpack.c.bf16 %v421_v60, %v419_v48  ;;  %v355_v62 = vpop.f32.mrf.mxu0 }
  0xd5   : > { %v859_v63 = vpack.c.bf16 %v538_v59, %v537_v58  ;;  %v404_v0 = vpop.f32.mrf.mxu1  ;;  %v531_v4 = vmul.f32 %v1260_v8, %v355_v62  ;;  %v523_v8 = vpop.permute.xlu0 %522 }
  0xd6   : > { %918 = vst [vmem:[%s1263_s9 + $0x30] sm:$0xff] %v899_v61  }
  0xd7   : > { %911 = vst [vmem:[%s1266_s10 + $0x30] sm:$0xff] %v859_v63  }
  0xda   : > { %v375_v1 = vpop.f32.mrf.mxu2 }
  0xdb   : > { %v424_v2 = vpop.f32.mrf.mxu3  ;;  %v539_v12 = vmul.f32 %v518_v10, %v375_v1 }
  0xdc   : > { %v357_v3 = vpop.f32.mrf.mxu0 }
  0xdd   : > { %v532_v5 = vmul.f32 %v483_v28, %v357_v3  ;;  %v406_v6 = vpop.f32.mrf.mxu1 }
  0xde   : > { %v884_v7 = vpack.c.bf16 %v406_v6, %v404_v0 }
  0xdf   : > { %v844_v9 = vpack.c.bf16 %v532_v5, %v531_v4 }
  0xe0   : > { %915 = vst [vmem:[%s1263_s9 + $0x18] sm:$0xff] %v884_v7  }
  0xe1   : > { %908 = vst [vmem:[%s1266_s10 + $0x18] sm:$0xff] %v844_v9  }
  0xe2   : > { %v377_v11 = vpop.f32.mrf.mxu2 }
  0xe3   : > { %v540_v13 = vmul.f32 %v523_v8, %v377_v11  ;;  %v426_v14 = vpop.f32.mrf.mxu3 }
  0xe4   : > { %v904_v15 = vpack.c.bf16 %v426_v14, %v424_v2 }
  0xe5   : > { %v864_v16 = vpack.c.bf16 %v540_v13, %v539_v12 }
  0xe6   : > { %919 = vst [vmem:[%s1263_s9 + $0x38] sm:$0xff] %v904_v15  }
  0xe7   : > { %912 = vst [vmem:[%s1266_s10 + $0x38] sm:$0xff] %v864_v16  }
  0xe8   : > { %1005 = shalt.err (!%p1002_p3)
}
  0xe9   : > { %s1075_s9 = smov 64   ;;  %s1076_s10 = smov 4  }
  0xea   : > { %928 = dma.vmem_to_hbm [thread:$0]  (%p1140_p5), %s624_s19, 1024, %s626_s28, %s606_s30, %s1075_s9, %s1075_s9, %s1076_s10  }
  0xeb   : > { %s611_s20 = scalar_lea.sflag [#allocation5], %s1258_s7  ;;  %s1020_s22 = sshra.s32 %s1294_s23, 4  ;;  %s1021_s22 = int_to_ptr.hbm [resolvable:$true] %s1020_s22 }
  0xec   : > { %s1022_s27 = scalar_lea.hbm %s1021_s22, 64  ;;  %s1026_s8 = scalar_lea.hbm %s1343_s4, 128 }
  0xed   : > { %p1023_p4 = scmp.ne.s32.totalorder %s1021_s22, %s1022_s27  ;;  %p1027_p9 = scmp.lt.s32.totalorder %s1021_s22, %s1343_s4 }
  0xee   : > { %p1028_p10 = scmp.lt.s32.totalorder %s1026_s8, %s1022_s27 }
  0xef   : > { %p1024_p7 = pnand %p1023_p4, %p1140_p5 }
  0xf0   : > { %p1029_p11 = por %p1028_p10, %p1027_p9 }
  0xf1   : > { %p1025_p8 = pneg %p1024_p7 }
  0xf3   : > { %p1030_p12 = pnand %p1029_p11, %p1025_p8 }
  0xf5   : > { %1033 = shalt.err (!%p1030_p12)
}
  0xf6   : > { %929 = dma.vmem_to_hbm [thread:$0]  (%p1140_p5), %s1292_s29, 1024, %s1294_s23, %s611_s20, %s1075_s9, %s1075_s9, %s1076_s10  }
  0xf7 PF: > { %p939_p13 = scmp.ge.s32.totalorder %s1072_s18, 2  ;;  %s657_s7 = sand.u32 1, %s1060_s15  }
  0xf8   : > { %s658_s19 = scalar_lea.sflag [#allocation3], %s657_s7 }
  0xf9   : > { %p933_p0 = pnand %p939_p13, %p1144_p6 }
  0xfb   : > { %p934_p1 = pneg %p933_p0 }
  0xfd   : > { %1051 = dma.done.wait (%p934_p1), %s658_s19, 1024  }
  0xfe   : > { %1053 = vsyncadd (%p934_p1), %s658_s19, 4294966272  ;;  %s668_s28 = scalar_lea.sflag [#allocation5], %s657_s7 }
  0xff   : > { %1055 = dma.done.wait (%p934_p1), %s668_s28, 1024  }
 0x100   : > { %1057 = vsyncadd (%p934_p1), %s668_s28, 4294966272  ;;  %p18_p5 = scmp.ge.s32.totalorder %s1127_s21, 4   ;;  %s1346_s15 = smov %s1064_s16 }
 0x101   : > { %s1347_s16 = smov %s1068_s17  ;;  %s1348_s17 = smov %s1138_s24 }
 0x102   : > { %s1349_s18 = smov %s1127_s21  ;;  %20 = sbr.rel (!%p18_p5) target bundleno = 5 (0x5), region = 87 }
 0x107   :  { %674 = vsyncpa [#allocation3], 1 }
 0x108   :  { %676 = vsyncpa [#allocation3 + $0x1], 1 }
 0x109   :  { %677 = vsyncpa [#allocation5], 1 }
 0x10a   :  { %679 = vsyncpa [#allocation5 + $0x1], 1 }

</bundles_post_ra>
